<compile_context>
chip_gen: v7x
topology: tpu7x:2x2x1
jax: 0.10.0
libtpu: 0.0.40
codegen_flags: <defaults>
</compile_context>

<pallas_src>
import functools
import math

import numpy as np

import jax
import jax.numpy as jnp
from jax.experimental import pallas as pl
from jax.experimental.pallas import tpu as pltpu


def _round_up(x, m):
    return ((x + m - 1) // m) * m


def _embedder_matmul_kernel(x_ref, w_ref, o_ref):
    # One (TILE_M, K) x (K, N) matmul per grid step.  The weight tile is
    # VMEM-resident across the whole grid (same block index every step); the
    # MXU accumulates in f32 regardless of the (bf16) input dtype.
    o_ref[...] = jnp.dot(
        x_ref[...], w_ref[...], preferred_element_type=jnp.float32
    ).astype(o_ref.dtype)


def prepare_embedder_weights(weights, vocab_sizes, embedding_size,
                             dtype=jnp.bfloat16):
    """Build the block-diagonal weight [K_total, N_total] ONCE at setup time.

    weights[i]: [embedding_size, vocab_sizes[i]] (PyTorch nn.Linear layout,
    y = x @ W.T).  Column block g holds W_g.T.  Built on host (numpy) to avoid
    per-group device round-trips; a single device transfer at the end.
    """
    num_groups = len(vocab_sizes)
    k_total = int(sum(vocab_sizes))
    n_total = embedding_size * num_groups

    w_bd = np.zeros((k_total, n_total), dtype=np.float32)
    row = 0
    for g, (v, w) in enumerate(zip(vocab_sizes, weights)):
        w_np = np.asarray(jax.device_get(w), dtype=np.float32)
        assert w_np.shape == (embedding_size, v), (w_np.shape, embedding_size, v)
        w_bd[row:row + v, g * embedding_size:(g + 1) * embedding_size] = w_np.T
        row += v
    return jnp.asarray(w_bd, dtype=dtype)


@functools.partial(jax.jit, static_argnames=("tile_m", "out_dtype"))
def embedder_forward(x, w_bd, *, tile_m=2048, out_dtype=jnp.float32):
    """x: [..., sum(vocab_sizes)]; w_bd: prepared [K_total, N_total] weight."""
    k_total = x.shape[-1]
    assert w_bd.shape[0] == k_total, (w_bd.shape, x.shape)
    n_total = w_bd.shape[-1]

    lead_shape = x.shape[:-1]
    m = math.prod(lead_shape) if lead_shape else 1

    # Compute dtype follows the prepared weight (bf16 by default).  Casting
    # here would cost an extra HBM pass; prefer delivering x in this dtype.
    x2d = x.reshape(m, k_total).astype(w_bd.dtype)

    # --- M tile selection -------------------------------------------------
    # * multiple of 8 (sublane granule); default 2048 amortizes the ~0.35 us
    #   per-grid-step pipeline overhead (this op is step-overhead / HBM bound).
    # * clamped to 8192 rows: double-buffered bf16-in / f32-out working set is
    #   ~12 MiB (lane-padded to 128 in VMEM), safely inside every generation's
    #   scoped VMEM, including v7x's 64 MiB physical / 32 MiB scoped budget.
    # * for small m, shrink so the grid has >= 2 steps (pipelining + megacore).
    tile_m = max(8, (int(tile_m) // 8) * 8)
    tile_m = min(tile_m, 8192)
    tm = max(8, min(tile_m, _round_up(pl.cdiv(m, 2), 8)))
    grid = (pl.cdiv(m, tm),)

    out_itemsize = jnp.dtype(out_dtype).itemsize
    cost = pl.CostEstimate(
        flops=2 * m * k_total * n_total,
        transcendentals=0,
        bytes_accessed=(
            m * k_total * x2d.dtype.itemsize
            + k_total * n_total * w_bd.dtype.itemsize
            + m * n_total * out_itemsize
        ),
    )

    out2d = pl.pallas_call(
        _embedder_matmul_kernel,
        out_shape=jax.ShapeDtypeStruct((m, n_total), out_dtype),
        grid=grid,
        in_specs=[
            # x tile, pipelined over the grid; ragged final M block is masked
            # by Pallas (each output row depends only on its own input row).
            pl.BlockSpec((tm, k_total), lambda i: (i, 0)),
            # block-diagonal weight, VMEM-resident across the whole grid.
            pl.BlockSpec((k_total, n_total), lambda i: (0, 0)),
        ],
        # Output emitted at its logical width: last dim equals the full array
        # dim (legal), and the masked vst hides under the output DMA.  This
        # removes the post-kernel [:m, :n_total] slice (an extra HBM pass).
        out_specs=pl.BlockSpec((tm, n_total), lambda i: (i, 0)),
        compiler_params=pltpu.CompilerParams(
            # TODO(synk): on v7x verify with xprof that the M axis actually
            # shards across both TensorCores; if not, switch to
            # pltpu.CORE_PARALLEL / an explicit pl.core_map mesh.
            dimension_semantics=("parallel",),
        ),
        cost_estimate=cost,
    )(x2d, w_bd)

    return out2d.reshape(*lead_shape, n_total)


def reference_forward(x, weights, vocab_sizes):
    # Pure-JAX reference reproducing the PyTorch loop exactly (f32).
    base = 0
    outs = []
    for v, w in zip(vocab_sizes, weights):
        outs.append(jnp.einsum("...k,ek->...e", x[..., base:base + v], w))
        base += v
    return jnp.concatenate(outs, axis=-1)


if __name__ == "__main__":
    embedding_size = 16
    vocab_sizes = (7, 5, 9)

    key = jax.random.PRNGKey(0)
    kx, *kws = jax.random.split(key, 1 + len(vocab_sizes))

    # x: [batch=2, seq=8, sum(vocab_sizes)=21]
    x_f32 = jax.random.normal(kx, (2, 8, sum(vocab_sizes)), dtype=jnp.float32)

    # W_i: [embedding_size, vocab_size_i] (nn.Linear weight layout), no bias.
    weights = tuple(
        jax.random.normal(kw, (embedding_size, v), dtype=jnp.float32) * 0.05
        for kw, v in zip(kws, vocab_sizes)
    )

    # One-time parameter prep (bf16 block-diagonal weight).
    w_bd = prepare_embedder_weights(
        weights, vocab_sizes, embedding_size, dtype=jnp.bfloat16
    )
    w_bd = jax.block_until_ready(w_bd)

    # Production path: the producer hands x already in the compute dtype so the
    # jit'd forward does no extra cast pass (done once here, outside the jit).
    x = x_f32.astype(jnp.bfloat16)

    out = embedder_forward(x, w_bd)
    out = jax.block_until_ready(out)

    ref = reference_forward(x_f32, weights, vocab_sizes)
    assert out.shape == (2, 8, embedding_size * len(vocab_sizes)), out.shape
    assert out.dtype == jnp.float32, out.dtype
    # bf16 inputs -> loosened tolerance vs the f32 reference (f32 MXU accum).
    assert jnp.allclose(out, ref, atol=2e-2, rtol=2e-2), float(
        jnp.max(jnp.abs(out - ref))
    )

    print("KERNEL_OK")
</pallas_src>

<mosaic_0001>
module attributes {stable_mosaic.version = 11 : i64} {
  func.func @_embedder_matmul_kernel(%arg0: i32, %arg1: memref<8x21xbf16, #tpu.memory_space<vmem>>, %arg2: memref<21x48xbf16, #tpu.memory_space<vmem>>, %arg3: memref<8x48xf32, #tpu.memory_space<vmem>>) attributes {dimension_semantics = [#tpu.dimension_semantics<parallel>], iteration_bounds = array<i64: 2>, scalar_prefetch = 0 : i64, scratch_operands = 0 : i64, tpu.core_type = #tpu.core_type<tc>, window_params = [{transform_indices = @transform_0, window_bounds = array<i64: 8, 21>}, {pipeline_mode = #tpu.pipeline_mode<synchronous>, transform_indices = @transform_1, window_bounds = array<i64: 21, 48>}, {transform_indices = @transform_2, window_bounds = array<i64: 8, 48>}]} {
    %c0 = arith.constant 0 : index
    %c0_0 = arith.constant 0 : index
    %0 = vector.load %arg1[%c0, %c0_0] : memref<8x21xbf16, #tpu.memory_space<vmem>>, vector<8x21xbf16>
    %c0_1 = arith.constant 0 : index
    %c0_2 = arith.constant 0 : index
    %1 = vector.load %arg2[%c0_1, %c0_2] : memref<21x48xbf16, #tpu.memory_space<vmem>>, vector<21x48xbf16>
    %cst = arith.constant dense<0.000000e+00> : vector<8x48xf32>
    %2 = tpu.matmul %0, %1, %cst {dimension_numbers = #tpu.dot_dimension_numbers<[1], [0], [0], [1], [0, 0, 1, 1], [], []>} : vector<8x21xbf16>, vector<21x48xbf16>, vector<8x48xf32> -> vector<8x48xf32>
    %c0_3 = arith.constant 0 : index
    %c0_4 = arith.constant 0 : index
    %3 = vector.load %arg3[%c0_3, %c0_4] : memref<8x48xf32, #tpu.memory_space<vmem>>, vector<8x48xf32>
    tpu.vector_store %arg3[%c0_3, %c0_4], %2 {strides = array<i32>} : memref<8x48xf32, #tpu.memory_space<vmem>>, vector<8x48xf32>,
    return
  }
  func.func @transform_0(%arg0: i32) -> (i32, i32) {
    %c0_i32 = arith.constant 0 : i32
    %c0_i32_0 = arith.constant 0 : i32
    return %arg0, %c0_i32 : i32, i32
  }
  func.func @transform_1(%arg0: i32) -> (i32, i32) {
    %c0_i32 = arith.constant 0 : i32
    %c0_i32_0 = arith.constant 0 : i32
    %c0_i32_1 = arith.constant 0 : i32
    return %c0_i32, %c0_i32_0 : i32, i32
  }
  func.func @transform_2(%arg0: i32) -> (i32, i32) {
    %c0_i32 = arith.constant 0 : i32
    %c0_i32_0 = arith.constant 0 : i32
    return %arg0, %c0_i32 : i32, i32
  }
}

</mosaic_0001>

<bundles_post_ra>
// kernel: embedder_forward.1
= control target key start
LH: loop header
LB: loop body
LE: loop exit
PB: predicated region body
PF: predicated region fallthrough
CT: control target
= control target key end

     0   :  { %7 = vsyncpa [#allocation3], 0  ;;  %s777_s0 = inlined_call_operand.hbm [shape: bf16[16,21], index: 0, kind: input, shape index: {}]   ;;  %s778_s1 = inlined_call_operand.hbm [shape: bf16[21,48], index: 1, kind: input, shape index: {}]   ;;  %s779_s2 = inlined_call_operand.hbm [shape: f32[16,48], index: 2, kind: output, shape index: {}]  }
   0x1   :  { %9 = vsyncpa [#allocation3 + $0x1], 0 }
   0x2   :  { %10 = vsyncpa [#allocation6], 0 }
   0x3   :  { %11 = vsyncpa [#allocation4], 0 }
   0x4   :  { %13 = vsyncpa [#allocation4 + $0x1], 0  ;;  %s580_s9 = smov 0   ;;  %s582_s10 = smov 0  }
   0x5   :  { %s584_s11 = smov 0   ;;  %s586_s12 = smov 0  }
   0x6 LB: > { %s601_s13 = sadd.s32 4294967295, %s555_s12   ;;  %s335_s14 = sadd.s32 4294967294, %s555_s12   ;;  %s555_s12 = sphi %s586_s12, %s799_s12   ;;  %s551_s11 = sphi %s584_s11, %s798_s11   ;;  %s547_s10 = sphi %s582_s10, %s797_s10   ;;  %s543_s9 = sphi %s580_s9, %s796_s9  }
   0x7   : > { %p39_p0 = scmp.ne.s32.totalorder %s547_s10, %s543_s9  ;;  %p780_p1 = scmp.eq.s32.totalorder %s601_s13, 0 }
   0x8   : > { %p90_p3 = scmp.eq.s32.totalorder %s335_s14, 1  ;;  %p336_p5 = scmp.ge.s32.totalorder %s555_s12, 1 }
   0x9   : > { %p610_p4 = por %p780_p1, %p39_p0  ;;  %p97_p7 = scmp.lt.s32.totalorder %s555_s12, 3 }
   0xa   : > { %p615_p6 = por %p90_p3, %p39_p0  ;;  %s557_s18 = smov [#allocation5]  }
   0xb   : > { %s783_s15 = scalar_select %p610_p4, 1, 0 }
   0xc   : > { %s784_s16 = scalar_select %p615_p6, 1, 0 }
   0xd   : > { %p620_p8 = pnand %p336_p5, %p97_p7  ;;  %s109_s19 = sshll.u32 %s557_s18, 4  ;;  %s624_s19 = int_to_ptr.vmem [resolvable:$true] %s109_s19 }
   0xe   : > { %s636_s21 = sadd.s32 1, %s555_s12   ;;  %s26_s22 = sadd.s32 1, %s551_s11 }
   0xf   : > { %s785_s17 = scalar_select %p620_p8, 1, 0 }
  0x10   : > { %p371_p9 = pneg %p620_p8  ;;  %s23_s23 = ssub.s32 %s555_s12, %s636_s21 }
  0x11   : > { %s427_s26 = scalar_lea.hbm %s778_s1, 192 }
  0x12   : > { %p631_p11 = pnand %p371_p9, %p780_p1  ;;  %p428_p12 = scmp.ne.s32.totalorder %s778_s1, %s427_s26 }
  0x13   : > { %p434_p5 = scmp.lt.u32.totalorder %s427_s26, %s778_s1 }
  0x14   : > { %p429_p13 = pneg %p631_p11 }
  0x16   : > { %p430_p0 = pnand %p429_p13, %p428_p12 }
  0x18   : > { %p431_p3 = pneg %p430_p0 }
  0x1a   : > { %p436_p7 = pnand %p434_p5, %p431_p3 }
  0x1c   : > { %439 = shalt.err (!%p436_p7)
}
  0x1d   : > { %s440_s3 = scalar_lea.vmem %s624_s19, 192  ;;  %p448_p2 = scmp.lt.s32.totalorder %s624_s19, %s624_s19 }
  0x1e   : > { %p441_p9 = scmp.ne.s32.totalorder %s624_s19, %s440_s3  ;;  %p449_p6 = scmp.lt.s32.totalorder %s440_s3, %s440_s3 }
  0x20   : > { %p443_p10 = pnand %p441_p9, %p429_p13  ;;  %p450_p4 = por %p449_p6, %p448_p2 }
  0x22   : > { %p444_p1 = pneg %p443_p10 }
  0x24   : > { %p451_p8 = pnand %p450_p4, %p444_p1 }
  0x26   : > { %454 = shalt.err (!%p451_p8)
}
  0x27   : > { %s558_s4 = smov 64   ;;  %s559_s5 = smov 4  }
  0x28   : > { %374 = dma.hbm_to_vmem [thread:$0]  (!%p631_p11), %s778_s1, 192, %s624_s19, [#allocation6], %s558_s4, %s558_s4, %s559_s5  }
  0x29   : > { %p24_p2 = scmp.eq.s32.totalorder %s23_s23, 0  ;;  %p33_p1 = scmp.ne.s32.totalorder %s551_s11, %s547_s10 }
  0x2a   : > { %p34_p4 = scmp.eq.s32.totalorder %s555_s12, 0  ;;  %p384_p6 = scmp.lt.s32.totalorder %s555_s12, 2 }
  0x2b   : > { %s667_s8 = scalar_select %p24_p2, %s551_s11, %s26_s22  }
  0x2c   : > { %p35_p8 = por %p34_p4, %p33_p1  ;;  %p787_p10 = scmp.eq.s32.totalorder %s601_s13, 1 }
  0x2d   : > { %s123_s18 = sand.u32 1, %s551_s11   ;;  %s340_s24 = sshll.u32 %s555_s12, 6 }
  0x2e   : > { %p671_p12 = por %p787_p10, %p33_p1  ;;  %s339_s25 = sshll.u32 %s123_s18, 2 }
  0x2f   : > { %s680_s27 = scalar_lea.hbm %s777_s0, %s340_s24  ;;  %s127_s19 = scalar_lea.vmem [#allocation2], %s339_s25 }
  0x30   : > { %s134_s22 = sshll.u32 %s127_s19, 4  ;;  %p682_p11 = pnand %p384_p6, %p35_p8  ;;  %s686_s22 = int_to_ptr.vmem [resolvable:$true] %s134_s22 }
  0x31   : > { %s124_s28 = scalar_lea.sflag [#allocation3], %s123_s18  ;;  %s455_s29 = scalar_lea.hbm %s680_s27, 64 }
  0x32   : > { %p456_p13 = scmp.ne.s32.totalorder %s680_s27, %s455_s29  ;;  %p457_p0 = pneg %p682_p11 }
  0x33   : > { %s460_s4 = scalar_lea.hbm %s777_s0, 128  ;;  %p461_p7 = scmp.lt.u32.totalorder %s680_s27, %s777_s0 }
  0x34   : > { %p458_p3 = pnand %p457_p0, %p456_p13  ;;  %p462_p9 = scmp.lt.u32.totalorder %s460_s4, %s455_s29 }
  0x35   : > { %p464_p1 = scmp.lt.u32.totalorder %s455_s29, %s680_s27 }
  0x36   : > { %p459_p5 = pneg %p458_p3  ;;  %p463_p2 = por %p462_p9, %p461_p7 }
  0x38   : > { %p465_p4 = por %p464_p1, %p463_p2 }
  0x3a   : > { %p466_p6 = pnand %p465_p4, %p459_p5 }
  0x3c   : > { %469 = shalt.err (!%p466_p6)
}
  0x3d   : > { %s470_s7 = scalar_lea.vmem %s686_s22, 64  ;;  %s560_s18 = smov [#allocation2]  }
  0x3e   : > { %p471_p8 = scmp.ne.s32.totalorder %s686_s22, %s470_s7  ;;  %s475_s24 = sshll.u32 %s560_s18, 4  ;;  %s476_s24 = int_to_ptr.vmem [resolvable:$false] %s475_s24 }
  0x3f   : > { %s477_s25 = scalar_lea.vmem %s476_s24, 128  ;;  %p478_p3 = scmp.lt.s32.totalorder %s686_s22, %s476_s24 }
  0x40   : > { %p473_p10 = pnand %p471_p8, %p457_p0  ;;  %p479_p7 = scmp.lt.s32.totalorder %s477_s25, %s470_s7 }
  0x42   : > { %p474_p13 = pneg %p473_p10  ;;  %p480_p9 = por %p479_p7, %p478_p3 }
  0x44   : > { %p481_p2 = pnand %p480_p9, %p474_p13 }
  0x46   : > { %484 = shalt.err (!%p481_p2)
}
  0x47   : > { %378 = dma.hbm_to_vmem [thread:$0]  (!%p682_p11), %s680_s27, 64, %s686_s22, %s124_s28  }
  0x48   : > { %p790_p5 = scmp.ne.s32.totalorder %s785_s17, 0 }
  0x49   : > { %s716_s20 = sand.u32 (!%p790_p5), 1, %s547_s10   ;;  %p791_p0 = scmp.ne.s32.totalorder (!%p790_p5), %s783_s15, 0 }
  0x4a   : > { %143 = sbr.rel (%p790_p5) target bundleno = 321 (0x141), region = 28  ;;  %s342_s26 = sshll.u32 (!%p790_p5), %s716_s20, 2 }
  0x4b   : > { %s146_s19 = scalar_lea.sflag (!%p790_p5), [#allocation3], %s716_s20  ;;  %s149_s29 = scalar_lea.vmem (!%p790_p5), [#allocation2], %s342_s26 }
  0x51   : > { %530 = dma.done.wait (%p791_p0), %s146_s19, 64  }
  0x52   : > { %532 = vsyncadd (%p791_p0), %s146_s19, 4294967232  ;;  %p792_p1 = scmp.eq.s32.totalorder %s601_s13, 0 }
  0x54   : > { %534 = dma.done.wait (%p792_p1), [#allocation6], 192   ;;  %p793_p11 = pmov %p792_p1 }
  0x55   : > { %v561_v0 = vmov 0.0   ;;  %vm192_vm0 = vcmask 1041408   ;;  %vm562_vm1 = vmmov 0   ;;  %vm193_vm2 = vcmask 1042432   ;;  %v425_v3 = vld [vmem:[#allocation5] sm:$0xff]   ;;  %s344_s15 = sshll.u32 %s716_s20, 3 }
  0x56   : > { %536 = vsyncadd (%p793_p11), [#allocation6], 4294967104  ;;  %355 = vmatprep.subr.bf16.mxu0 %v561_v0  ;;  %359 = vmatprep.mubr.msk.bf16.mxu0 %vm562_vm1, %v561_v0  ;;  %v563_v1 = vmov 65535   ;;  %v426_v5 = vld [vmem:[#allocation5 + $0x8] ss:$0 sps:$4 sm:$0x77]  }
  0x57   : > { %v194_v2 = vsel %vm192_vm0, 4294967295, %v563_v1  ;;  %356 = vmatpush3.bf16.msra.mxu0 %v425_v3  ;;  %v175_v7 = vld [vmem:[%s149_s29] sm:$0xf]  ;;  %vm188_vm3 = vcmask 171008   ;;  %s349_s17 = sshll.u32 %s601_s13, 7  ;;  %s173_s27 = scalar_lea.vmem [#allocation7], %s344_s15 }
  0x58   : > { %v195_v4 = vsel %vm193_vm2, %v194_v2, 0  ;;  %357 = vmatprep.subr.bf16.mxu0 %v561_v0  ;;  %s255_s22 = sshll.u32 %s173_s27, 4  ;;  %vm239_vm4 = vcmask 392192   ;;  %s733_s30 = scalar_lea.hbm %s779_s2, %s349_s17  ;;  %s735_s22 = int_to_ptr.vmem [resolvable:$true] %s255_s22 }
  0x59   : > { %v197_v6 = vand.u32 %v426_v5, %v195_v4  ;;  %s242_s3 = scalar_lea.sflag [#allocation4], %s716_s20  ;;  %s485_s4 = scalar_lea.vmem %s735_s22, 128 }
  0x5a   : > { %p486_p4 = scmp.ne.s32.totalorder %s735_s22, %s485_s4  ;;  %s564_s13 = smov [#allocation7]  }
  0x5b   : > { %358 = vmatpush3.bf16.msra.mxu0 %v197_v6  ;;  %s489_s5 = sshll.u32 %s564_s13, 4  ;;  %s490_s5 = int_to_ptr.vmem [resolvable:$false] %s489_s5 }
  0x5c   : > { %p487_p6 = pnand %p486_p4, %p671_p12  ;;  %s491_s6 = scalar_lea.vmem %s490_s5, 256 }
  0x5d   : > { %p492_p10 = scmp.lt.s32.totalorder %s735_s22, %s490_s5  ;;  %p493_p13 = scmp.lt.s32.totalorder %s491_s6, %s485_s4 }
  0x5e   : > { %360 = vmatmul.mubr.msk.bf16.vlgmr.msra.gmra.mrb[0].mxu0 %vm188_vm3, %v175_v7  ;;  %p488_p8 = pneg %p487_p6 }
  0x5f   : > { %p494_p3 = por %p493_p13, %p492_p10 }
  0x61   : > { %p495_p7 = pnand %p494_p3, %p488_p8 }
 0x131   : > { %v233_v8 = vpop.f32.mrb[0].mxu0 }
 0x132   : > { %240 = vst.msk [vmem:[%s173_s27] sm:$0xff] %vm239_vm4, %v233_v8  ;;  %v361_v9 = vpop.f32.mrb[1].mxu0 }
 0x133   : > { %v236_v10 = vpop.f32.mrb[2].mxu0 }
 0x134   : > { %498 = shalt.err (!%p495_p7)
}
 0x135   : > { %s499_s7 = scalar_lea.hbm %s733_s30, 128  ;;  %s503_s25 = scalar_lea.hbm %s779_s2, 256 }
 0x136   : > { %p500_p9 = scmp.ne.s32.totalorder %s733_s30, %s499_s7  ;;  %p504_p0 = scmp.lt.u32.totalorder %s733_s30, %s779_s2 }
 0x137   : > { %p505_p1 = scmp.lt.u32.totalorder %s503_s25, %s499_s7  ;;  %p507_p4 = scmp.lt.u32.totalorder %s499_s7, %s733_s30 }
 0x138   : > { %p501_p2 = pnand %p500_p9, %p671_p12 }
 0x139   : > { %p506_p11 = por %p505_p1, %p504_p0 }
 0x13a   : > { %p502_p5 = pneg %p501_p2 }
 0x13b   : > { %p508_p6 = por %p507_p4, %p506_p11 }
 0x13d   : > { %p509_p8 = pnand %p508_p6, %p502_p5 }
 0x13f   : > { %512 = shalt.err (!%p509_p8)
}
 0x140   : > { %369 = dma.vmem_to_hbm [thread:$0]  (%p671_p12), %s735_s22, 128, %s733_s30, %s242_s3   ;;  %v362_v11 = vpop.f32.mrb[3].mxu0 }
 0x141 PF: > { %s267_s19 = sand.u32 1, %s543_s9   ;;  %p794_p10 = scmp.ne.s32.totalorder %s784_s16, 0 }
 0x142   : > { %p795_p13 = scmp.ge.s32.totalorder %s555_s12, 2  ;;  %s268_s29 = scalar_lea.sflag [#allocation4], %s267_s19 }
 0x144   : > { %p380_p3 = pnand %p795_p13, %p794_p10 }
 0x146   : > { %538 = dma.done.wait (!%p380_p3), %s268_s29, 128  }
 0x147   : > { %540 = vsyncadd (!%p380_p3), %s268_s29, 4294967168  ;;  %p16_p7 = scmp.ge.s32.totalorder %s636_s21, 4   ;;  %s796_s9 = smov %s547_s10 }
 0x148   : > { %s797_s10 = smov %s551_s11  ;;  %s798_s11 = smov %s667_s8 }
 0x149   : > { %s799_s12 = smov %s636_s21  ;;  %18 = sbr.rel (!%p16_p7) target bundleno = 6 (0x6), region = 77 }
 0x150   :  { %273 = vsyncpa [#allocation3], 1 }
 0x151   :  { %275 = vsyncpa [#allocation3 + $0x1], 1 }
 0x152   :  { %276 = vsyncpa [#allocation6], 1 }
 0x153   :  { %277 = vsyncpa [#allocation4], 1 }
 0x154   :  { %279 = vsyncpa [#allocation4 + $0x1], 1 }

</bundles_post_ra>
